<compile_context>
chip_gen: v6e
topology: v6e:2x2x1
jax: 0.10.0
libtpu: 0.0.40
codegen_flags: <defaults>
</compile_context>

<pallas_src>
import functools

import jax
import jax.numpy as jnp
from jax import lax
from jax.experimental import pallas as pl
from jax.experimental.pallas import tpu as pltpu


# ----------------------------------------------------------------------------
# Pallas plumbing: tiny problem -> single grid step, full-array VMEM blocks.
# ----------------------------------------------------------------------------
def _full_spec(shape):
    nd = len(shape)
    return pl.BlockSpec(shape, lambda i, _nd=nd: (0,) * _nd)


def _pcall(kernel, arrays, out_shapes):
    """Run `kernel` once with every array resident as a full VMEM block."""
    in_specs = [_full_spec(a.shape) for a in arrays]
    out_shape = [jax.ShapeDtypeStruct(s, jnp.float32) for s in out_shapes]
    out_specs = [_full_spec(s) for s in out_shapes]
    return pl.pallas_call(
        kernel,
        grid=(1,),
        in_specs=in_specs,
        out_specs=out_specs,
        out_shape=out_shape,
        compiler_params=pltpu.CompilerParams(dimension_semantics=("arbitrary",)),
    )(*arrays)


# ----------------------------------------------------------------------------
# Fused Encoder kernel: 3 x (GCNConv -> BatchNorm1d(train stats) -> ReLU -> +residual)
# ----------------------------------------------------------------------------
def encoder_kernel(x_ref, a_ref, wr_ref, br_ref,
                   w1_ref, b1_ref, g1_ref, be1_ref,
                   w2_ref, b2_ref, g2_ref, be2_ref,
                   w3_ref, b3_ref, g3_ref, be3_ref,
                   x1_ref, x2_ref, x3_ref, *, eps, inv_n):
    x = x_ref[...]          # [N, Din]
    a = a_ref[...]          # [N, N]  symmetric-normalized adjacency (with self loops)

    def block(h_in, w_t, b, gamma, beta, identity):
        # GCNConv: (A_hat @ (h_in @ W^T)) + bias      (lin has no bias; conv bias after agg)
        h = jnp.dot(h_in, w_t, preferred_element_type=jnp.float32)          # [N, H]
        agg = jnp.dot(a, h, preferred_element_type=jnp.float32) + b         # [N, H]
        # BatchNorm1d (training-mode batch statistics over nodes, biased var)
        mean = jnp.sum(agg, axis=0, keepdims=True) * inv_n                  # [1, H]
        cen = agg - mean
        var = jnp.sum(cen * cen, axis=0, keepdims=True) * inv_n             # [1, H]
        y = gamma * cen * lax.rsqrt(var + eps) + beta
        # ReLU + residual
        return jnp.maximum(y, 0.0) + identity

    # layer1: residual = Linear(Din, H) (projection computed on the MXU once)
    identity1 = jnp.dot(x, wr_ref[...], preferred_element_type=jnp.float32) + br_ref[...]
    x1 = block(x, w1_ref[...], b1_ref[...], g1_ref[...], be1_ref[...], identity1)
    x1_ref[...] = x1
    # layer2 / layer3: in_channels == out_channels -> residual = Identity (the layer input)
    x2 = block(x1, w2_ref[...], b2_ref[...], g2_ref[...], be2_ref[...], x1)
    x2_ref[...] = x2
    x3 = block(x2, w3_ref[...], b3_ref[...], g3_ref[...], be3_ref[...], x2)
    x3_ref[...] = x3


# ----------------------------------------------------------------------------
# JAX glue: dense symmetric-normalized adjacency (data-dependent scatter).
# ----------------------------------------------------------------------------
def build_gcn_adjacency(edge_index, n_nodes):
    src = edge_index[0]
    dst = edge_index[1]
    # A[i, j] = weight of edge j -> i   (flow = source_to_target)
    a = jnp.zeros((n_nodes, n_nodes), jnp.float32).at[dst, src].add(1.0)
    a = a + jnp.eye(n_nodes, dtype=jnp.float32)          # add_self_loops
    deg = jnp.sum(a, axis=1)                             # in-degree incl. self loop
    dinv = jnp.where(deg > 0.0, lax.rsqrt(deg), 0.0)
    return dinv[:, None] * a * dinv[None, :]             # D^-1/2 (A+I) D^-1/2


# ----------------------------------------------------------------------------
# Forward wrapper
# ----------------------------------------------------------------------------
def encoder_forward(params, x, edge_index):
    n_nodes, in_dim = x.shape
    hidden = params["l1_gcn_w"].shape[0]

    a_norm = build_gcn_adjacency(edge_index, n_nodes)

    # residual of layer1: Linear if in_dim != hidden else Identity
    if in_dim != hidden:
        wr_t = params["l1_res_w"].T                      # pre-transposed (trace-time, free)
        br = params["l1_res_b"][None, :]
    else:
        wr_t = jnp.eye(hidden, dtype=jnp.float32)
        br = jnp.zeros((1, hidden), jnp.float32)

    arrays = [
        x, a_norm, wr_t, br,
        params["l1_gcn_w"].T, params["l1_gcn_b"][None, :],
        params["l1_bn_g"][None, :], params["l1_bn_b"][None, :],
        params["l2_gcn_w"].T, params["l2_gcn_b"][None, :],
        params["l2_bn_g"][None, :], params["l2_bn_b"][None, :],
        params["l3_gcn_w"].T, params["l3_gcn_b"][None, :],
        params["l3_bn_g"][None, :], params["l3_bn_b"][None, :],
    ]
    out_shapes = [(n_nodes, hidden)] * 3
    kernel = functools.partial(encoder_kernel, eps=1e-5, inv_n=1.0 / n_nodes)
    x1, x2, x3 = _pcall(kernel, arrays, out_shapes)
    return x1, x2, x3


# ----------------------------------------------------------------------------
# Deterministic parameter init (shapes follow the torch module __init__)
# ----------------------------------------------------------------------------
def init_params(key, input_dim, hidden_dim):
    ks = jax.random.split(key, 8)

    def nrm(k, shape, scale=0.1):
        return scale * jax.random.normal(k, shape, jnp.float32)

    p = dict(
        # layer1
        l1_gcn_w=nrm(ks[0], (hidden_dim, input_dim)),
        l1_gcn_b=jnp.zeros((hidden_dim,), jnp.float32),
        l1_bn_g=jnp.ones((hidden_dim,), jnp.float32),
        l1_bn_b=jnp.zeros((hidden_dim,), jnp.float32),
        l1_res_w=nrm(ks[1], (hidden_dim, input_dim)),
        l1_res_b=nrm(ks[2], (hidden_dim,)),
        # layer2
        l2_gcn_w=nrm(ks[3], (hidden_dim, hidden_dim)),
        l2_gcn_b=jnp.zeros((hidden_dim,), jnp.float32),
        l2_bn_g=jnp.ones((hidden_dim,), jnp.float32),
        l2_bn_b=jnp.zeros((hidden_dim,), jnp.float32),
        # layer3
        l3_gcn_w=nrm(ks[4], (hidden_dim, hidden_dim)),
        l3_gcn_b=jnp.zeros((hidden_dim,), jnp.float32),
        l3_bn_g=jnp.ones((hidden_dim,), jnp.float32),
        l3_bn_b=jnp.zeros((hidden_dim,), jnp.float32),
    )
    return p


if __name__ == "__main__":
    key = jax.random.PRNGKey(0)
    k_param, k_x = jax.random.split(key, 2)

    n_nodes, input_dim, hidden_dim = 16, 4, 32

    # bidirectional ring graph on n_nodes nodes
    edges = []
    for a in range(n_nodes):
        b = (a + 1) % n_nodes
        edges.append((a, b))
        edges.append((b, a))
    edge_index = jnp.array(edges, dtype=jnp.int32).T                 # [2, E], E = 32

    x = jax.random.normal(k_x, (n_nodes, input_dim), jnp.float32)
    params = init_params(k_param, input_dim, hidden_dim)

    x1, x2, x3 = encoder_forward(params, x, edge_index)
    jax.block_until_ready((x1, x2, x3))
    assert x1.shape == (n_nodes, hidden_dim)
    assert x2.shape == (n_nodes, hidden_dim)
    assert x3.shape == (n_nodes, hidden_dim)
    print("KERNEL_OK")
</pallas_src>

<mosaic_0001>
module attributes {stable_mosaic.version = 11 : i64} {
  func.func @encoder_kernel(%arg0: i32, %arg1: memref<16x4xf32, #tpu.memory_space<vmem>>, %arg2: memref<16x16xf32, #tpu.memory_space<vmem>>, %arg3: memref<4x32xf32, #tpu.memory_space<vmem>>, %arg4: memref<1x32xf32, #tpu.memory_space<vmem>>, %arg5: memref<4x32xf32, #tpu.memory_space<vmem>>, %arg6: memref<1x32xf32, #tpu.memory_space<vmem>>, %arg7: memref<1x32xf32, #tpu.memory_space<vmem>>, %arg8: memref<1x32xf32, #tpu.memory_space<vmem>>, %arg9: memref<32x32xf32, #tpu.memory_space<vmem>>, %arg10: memref<1x32xf32, #tpu.memory_space<vmem>>, %arg11: memref<1x32xf32, #tpu.memory_space<vmem>>, %arg12: memref<1x32xf32, #tpu.memory_space<vmem>>, %arg13: memref<32x32xf32, #tpu.memory_space<vmem>>, %arg14: memref<1x32xf32, #tpu.memory_space<vmem>>, %arg15: memref<1x32xf32, #tpu.memory_space<vmem>>, %arg16: memref<1x32xf32, #tpu.memory_space<vmem>>, %arg17: memref<16x32xf32, #tpu.memory_space<vmem>>, %arg18: memref<16x32xf32, #tpu.memory_space<vmem>>, %arg19: memref<16x32xf32, #tpu.memory_space<vmem>>) attributes {dimension_semantics = [#tpu.dimension_semantics<arbitrary>], iteration_bounds = array<i64: 1>, scalar_prefetch = 0 : i64, scratch_operands = 0 : i64, tpu.core_type = #tpu.core_type<tc>, window_params = [{pipeline_mode = #tpu.pipeline_mode<synchronous>, transform_indices = @transform_0, window_bounds = array<i64: 16, 4>}, {pipeline_mode = #tpu.pipeline_mode<synchronous>, transform_indices = @transform_1, window_bounds = array<i64: 16, 16>}, {pipeline_mode = #tpu.pipeline_mode<synchronous>, transform_indices = @transform_2, window_bounds = array<i64: 4, 32>}, {pipeline_mode = #tpu.pipeline_mode<synchronous>, transform_indices = @transform_3, window_bounds = array<i64: 1, 32>}, {pipeline_mode = #tpu.pipeline_mode<synchronous>, transform_indices = @transform_4, window_bounds = array<i64: 4, 32>}, {pipeline_mode = #tpu.pipeline_mode<synchronous>, transform_indices = @transform_5, window_bounds = array<i64: 1, 32>}, {pipeline_mode = #tpu.pipeline_mode<synchronous>, transform_indices = @transform_6, window_bounds = array<i64: 1, 32>}, {pipeline_mode = #tpu.pipeline_mode<synchronous>, transform_indices = @transform_7, window_bounds = array<i64: 1, 32>}, {pipeline_mode = #tpu.pipeline_mode<synchronous>, transform_indices = @transform_8, window_bounds = array<i64: 32, 32>}, {pipeline_mode = #tpu.pipeline_mode<synchronous>, transform_indices = @transform_9, window_bounds = array<i64: 1, 32>}, {pipeline_mode = #tpu.pipeline_mode<synchronous>, transform_indices = @transform_10, window_bounds = array<i64: 1, 32>}, {pipeline_mode = #tpu.pipeline_mode<synchronous>, transform_indices = @transform_11, window_bounds = array<i64: 1, 32>}, {pipeline_mode = #tpu.pipeline_mode<synchronous>, transform_indices = @transform_12, window_bounds = array<i64: 32, 32>}, {pipeline_mode = #tpu.pipeline_mode<synchronous>, transform_indices = @transform_13, window_bounds = array<i64: 1, 32>}, {pipeline_mode = #tpu.pipeline_mode<synchronous>, transform_indices = @transform_14, window_bounds = array<i64: 1, 32>}, {pipeline_mode = #tpu.pipeline_mode<synchronous>, transform_indices = @transform_15, window_bounds = array<i64: 1, 32>}, {pipeline_mode = #tpu.pipeline_mode<synchronous>, transform_indices = @transform_16, window_bounds = array<i64: 16, 32>}, {pipeline_mode = #tpu.pipeline_mode<synchronous>, transform_indices = @transform_17, window_bounds = array<i64: 16, 32>}, {pipeline_mode = #tpu.pipeline_mode<synchronous>, transform_indices = @transform_18, window_bounds = array<i64: 16, 32>}]} {
    %c0 = arith.constant 0 : index
    %c0_0 = arith.constant 0 : index
    %0 = vector.load %arg1[%c0, %c0_0] : memref<16x4xf32, #tpu.memory_space<vmem>>, vector<16x4xf32>
    %c0_1 = arith.constant 0 : index
    %c0_2 = arith.constant 0 : index
    %1 = vector.load %arg2[%c0_1, %c0_2] : memref<16x16xf32, #tpu.memory_space<vmem>>, vector<16x16xf32>
    %c0_3 = arith.constant 0 : index
    %c0_4 = arith.constant 0 : index
    %2 = vector.load %arg3[%c0_3, %c0_4] : memref<4x32xf32, #tpu.memory_space<vmem>>, vector<4x32xf32>
    %cst = arith.constant dense<0.000000e+00> : vector<16x32xf32>
    %3 = tpu.matmul %0, %2, %cst {dimension_numbers = #tpu.dot_dimension_numbers<[1], [0], [0], [1], [0, 0, 1, 1], [], []>} : vector<16x4xf32>, vector<4x32xf32>, vector<16x32xf32> -> vector<16x32xf32>
    %c0_5 = arith.constant 0 : index
    %c0_6 = arith.constant 0 : index
    %4 = vector.load %arg4[%c0_5, %c0_6] : memref<1x32xf32, #tpu.memory_space<vmem>>, vector<1x32xf32>
    %5 = vector.broadcast %4 : vector<1x32xf32> to vector<16x32xf32>
    %6 = arith.addf %3, %5 : vector<16x32xf32>
    %c0_7 = arith.constant 0 : index
    %c0_8 = arith.constant 0 : index
    %7 = vector.load %arg5[%c0_7, %c0_8] : memref<4x32xf32, #tpu.memory_space<vmem>>, vector<4x32xf32>
    %c0_9 = arith.constant 0 : index
    %c0_10 = arith.constant 0 : index
    %8 = vector.load %arg6[%c0_9, %c0_10] : memref<1x32xf32, #tpu.memory_space<vmem>>, vector<1x32xf32>
    %c0_11 = arith.constant 0 : index
    %c0_12 = arith.constant 0 : index
    %9 = vector.load %arg7[%c0_11, %c0_12] : memref<1x32xf32, #tpu.memory_space<vmem>>, vector<1x32xf32>
    %c0_13 = arith.constant 0 : index
    %c0_14 = arith.constant 0 : index
    %10 = vector.load %arg8[%c0_13, %c0_14] : memref<1x32xf32, #tpu.memory_space<vmem>>, vector<1x32xf32>
    %cst_15 = arith.constant dense<0.000000e+00> : vector<16x32xf32>
    %11 = tpu.matmul %0, %7, %cst_15 {dimension_numbers = #tpu.dot_dimension_numbers<[1], [0], [0], [1], [0, 0, 1, 1], [], []>} : vector<16x4xf32>, vector<4x32xf32>, vector<16x32xf32> -> vector<16x32xf32>
    %cst_16 = arith.constant dense<0.000000e+00> : vector<16x32xf32>
    %12 = tpu.matmul %1, %11, %cst_16 {dimension_numbers = #tpu.dot_dimension_numbers<[1], [0], [0], [1], [0, 0, 1, 1], [], []>} : vector<16x16xf32>, vector<16x32xf32>, vector<16x32xf32> -> vector<16x32xf32>
    %13 = vector.broadcast %8 : vector<1x32xf32> to vector<16x32xf32>
    %14 = arith.addf %12, %13 : vector<16x32xf32>
    %cst_17 = arith.constant dense<0.000000e+00> : vector<32xf32>
    %15 = vector.multi_reduction <add>, %14, %cst_17 [0] : vector<16x32xf32> to vector<32xf32>
    %16 = vector.shape_cast %15 : vector<32xf32> to vector<1x32xf32>
    %cst_18 = arith.constant 6.250000e-02 : f32
    %17 = vector.broadcast %cst_18 : f32 to vector<1x32xf32>
    %18 = arith.mulf %16, %17 : vector<1x32xf32>
    %19 = vector.broadcast %18 : vector<1x32xf32> to vector<16x32xf32>
    %20 = arith.subf %14, %19 : vector<16x32xf32>
    %21 = arith.mulf %20, %20 : vector<16x32xf32>
    %cst_19 = arith.constant dense<0.000000e+00> : vector<32xf32>
    %22 = vector.multi_reduction <add>, %21, %cst_19 [0] : vector<16x32xf32> to vector<32xf32>
    %23 = vector.shape_cast %22 : vector<32xf32> to vector<1x32xf32>
    %cst_20 = arith.constant 6.250000e-02 : f32
    %24 = vector.broadcast %cst_20 : f32 to vector<1x32xf32>
    %25 = arith.mulf %23, %24 : vector<1x32xf32>
    %26 = vector.broadcast %9 : vector<1x32xf32> to vector<16x32xf32>
    %27 = arith.mulf %26, %20 : vector<16x32xf32>
    %cst_21 = arith.constant 9.99999974E-6 : f32
    %28 = vector.broadcast %cst_21 : f32 to vector<1x32xf32>
    %29 = arith.addf %25, %28 : vector<1x32xf32>
    %30 = math.rsqrt %29 : vector<1x32xf32>
    %31 = vector.broadcast %30 : vector<1x32xf32> to vector<16x32xf32>
    %32 = arith.mulf %27, %31 : vector<16x32xf32>
    %33 = vector.broadcast %10 : vector<1x32xf32> to vector<16x32xf32>
    %34 = arith.addf %32, %33 : vector<16x32xf32>
    %cst_22 = arith.constant 0.000000e+00 : f32
    %35 = vector.broadcast %cst_22 : f32 to vector<16x32xf32>
    %36 = arith.maximumf %34, %35 : vector<16x32xf32>
    %37 = arith.addf %36, %6 : vector<16x32xf32>
    %c0_23 = arith.constant 0 : index
    %c0_24 = arith.constant 0 : index
    %38 = vector.load %arg17[%c0_23, %c0_24] : memref<16x32xf32, #tpu.memory_space<vmem>>, vector<16x32xf32>
    tpu.vector_store %arg17[%c0_23, %c0_24], %37 {strides = array<i32>} : memref<16x32xf32, #tpu.memory_space<vmem>>, vector<16x32xf32>,
    %c0_25 = arith.constant 0 : index
    %c0_26 = arith.constant 0 : index
    %39 = vector.load %arg9[%c0_25, %c0_26] : memref<32x32xf32, #tpu.memory_space<vmem>>, vector<32x32xf32>
    %c0_27 = arith.constant 0 : index
    %c0_28 = arith.constant 0 : index
    %40 = vector.load %arg10[%c0_27, %c0_28] : memref<1x32xf32, #tpu.memory_space<vmem>>, vector<1x32xf32>
    %c0_29 = arith.constant 0 : index
    %c0_30 = arith.constant 0 : index
    %41 = vector.load %arg11[%c0_29, %c0_30] : memref<1x32xf32, #tpu.memory_space<vmem>>, vector<1x32xf32>
    %c0_31 = arith.constant 0 : index
    %c0_32 = arith.constant 0 : index
    %42 = vector.load %arg12[%c0_31, %c0_32] : memref<1x32xf32, #tpu.memory_space<vmem>>, vector<1x32xf32>
    %cst_33 = arith.constant dense<0.000000e+00> : vector<16x32xf32>
    %43 = tpu.matmul %37, %39, %cst_33 {dimension_numbers = #tpu.dot_dimension_numbers<[1], [0], [0], [1], [0, 0, 1, 1], [], []>} : vector<16x32xf32>, vector<32x32xf32>, vector<16x32xf32> -> vector<16x32xf32>
    %cst_34 = arith.constant dense<0.000000e+00> : vector<16x32xf32>
    %44 = tpu.matmul %1, %43, %cst_34 {dimension_numbers = #tpu.dot_dimension_numbers<[1], [0], [0], [1], [0, 0, 1, 1], [], []>} : vector<16x16xf32>, vector<16x32xf32>, vector<16x32xf32> -> vector<16x32xf32>
    %45 = vector.broadcast %40 : vector<1x32xf32> to vector<16x32xf32>
    %46 = arith.addf %44, %45 : vector<16x32xf32>
    %cst_35 = arith.constant dense<0.000000e+00> : vector<32xf32>
    %47 = vector.multi_reduction <add>, %46, %cst_35 [0] : vector<16x32xf32> to vector<32xf32>
    %48 = vector.shape_cast %47 : vector<32xf32> to vector<1x32xf32>
    %cst_36 = arith.constant 6.250000e-02 : f32
    %49 = vector.broadcast %cst_36 : f32 to vector<1x32xf32>
    %50 = arith.mulf %48, %49 : vector<1x32xf32>
    %51 = vector.broadcast %50 : vector<1x32xf32> to vector<16x32xf32>
    %52 = arith.subf %46, %51 : vector<16x32xf32>
    %53 = arith.mulf %52, %52 : vector<16x32xf32>
    %cst_37 = arith.constant dense<0.000000e+00> : vector<32xf32>
    %54 = vector.multi_reduction <add>, %53, %cst_37 [0] : vector<16x32xf32> to vector<32xf32>
    %55 = vector.shape_cast %54 : vector<32xf32> to vector<1x32xf32>
    %cst_38 = arith.constant 6.250000e-02 : f32
    %56 = vector.broadcast %cst_38 : f32 to vector<1x32xf32>
    %57 = arith.mulf %55, %56 : vector<1x32xf32>
    %58 = vector.broadcast %41 : vector<1x32xf32> to vector<16x32xf32>
    %59 = arith.mulf %58, %52 : vector<16x32xf32>
    %cst_39 = arith.constant 9.99999974E-6 : f32
    %60 = vector.broadcast %cst_39 : f32 to vector<1x32xf32>
    %61 = arith.addf %57, %60 : vector<1x32xf32>
    %62 = math.rsqrt %61 : vector<1x32xf32>
    %63 = vector.broadcast %62 : vector<1x32xf32> to vector<16x32xf32>
    %64 = arith.mulf %59, %63 : vector<16x32xf32>
    %65 = vector.broadcast %42 : vector<1x32xf32> to vector<16x32xf32>
    %66 = arith.addf %64, %65 : vector<16x32xf32>
    %cst_40 = arith.constant 0.000000e+00 : f32
    %67 = vector.broadcast %cst_40 : f32 to vector<16x32xf32>
    %68 = arith.maximumf %66, %67 : vector<16x32xf32>
    %69 = arith.addf %68, %37 : vector<16x32xf32>
    %c0_41 = arith.constant 0 : index
    %c0_42 = arith.constant 0 : index
    %70 = vector.load %arg18[%c0_41, %c0_42] : memref<16x32xf32, #tpu.memory_space<vmem>>, vector<16x32xf32>
    tpu.vector_store %arg18[%c0_41, %c0_42], %69 {strides = array<i32>} : memref<16x32xf32, #tpu.memory_space<vmem>>, vector<16x32xf32>,
    %c0_43 = arith.constant 0 : index
    %c0_44 = arith.constant 0 : index
    %71 = vector.load %arg13[%c0_43, %c0_44] : memref<32x32xf32, #tpu.memory_space<vmem>>, vector<32x32xf32>
    %c0_45 = arith.constant 0 : index
    %c0_46 = arith.constant 0 : index
    %72 = vector.load %arg14[%c0_45, %c0_46] : memref<1x32xf32, #tpu.memory_space<vmem>>, vector<1x32xf32>
    %c0_47 = arith.constant 0 : index
    %c0_48 = arith.constant 0 : index
    %73 = vector.load %arg15[%c0_47, %c0_48] : memref<1x32xf32, #tpu.memory_space<vmem>>, vector<1x32xf32>
    %c0_49 = arith.constant 0 : index
    %c0_50 = arith.constant 0 : index
    %74 = vector.load %arg16[%c0_49, %c0_50] : memref<1x32xf32, #tpu.memory_space<vmem>>, vector<1x32xf32>
    %cst_51 = arith.constant dense<0.000000e+00> : vector<16x32xf32>
    %75 = tpu.matmul %69, %71, %cst_51 {dimension_numbers = #tpu.dot_dimension_numbers<[1], [0], [0], [1], [0, 0, 1, 1], [], []>} : vector<16x32xf32>, vector<32x32xf32>, vector<16x32xf32> -> vector<16x32xf32>
    %cst_52 = arith.constant dense<0.000000e+00> : vector<16x32xf32>
    %76 = tpu.matmul %1, %75, %cst_52 {dimension_numbers = #tpu.dot_dimension_numbers<[1], [0], [0], [1], [0, 0, 1, 1], [], []>} : vector<16x16xf32>, vector<16x32xf32>, vector<16x32xf32> -> vector<16x32xf32>
    %77 = vector.broadcast %72 : vector<1x32xf32> to vector<16x32xf32>
    %78 = arith.addf %76, %77 : vector<16x32xf32>
    %cst_53 = arith.constant dense<0.000000e+00> : vector<32xf32>
    %79 = vector.multi_reduction <add>, %78, %cst_53 [0] : vector<16x32xf32> to vector<32xf32>
    %80 = vector.shape_cast %79 : vector<32xf32> to vector<1x32xf32>
    %cst_54 = arith.constant 6.250000e-02 : f32
    %81 = vector.broadcast %cst_54 : f32 to vector<1x32xf32>
    %82 = arith.mulf %80, %81 : vector<1x32xf32>
    %83 = vector.broadcast %82 : vector<1x32xf32> to vector<16x32xf32>
    %84 = arith.subf %78, %83 : vector<16x32xf32>
    %85 = arith.mulf %84, %84 : vector<16x32xf32>
    %cst_55 = arith.constant dense<0.000000e+00> : vector<32xf32>
    %86 = vector.multi_reduction <add>, %85, %cst_55 [0] : vector<16x32xf32> to vector<32xf32>
    %87 = vector.shape_cast %86 : vector<32xf32> to vector<1x32xf32>
    %cst_56 = arith.constant 6.250000e-02 : f32
    %88 = vector.broadcast %cst_56 : f32 to vector<1x32xf32>
    %89 = arith.mulf %87, %88 : vector<1x32xf32>
    %90 = vector.broadcast %73 : vector<1x32xf32> to vector<16x32xf32>
    %91 = arith.mulf %90, %84 : vector<16x32xf32>
    %cst_57 = arith.constant 9.99999974E-6 : f32
    %92 = vector.broadcast %cst_57 : f32 to vector<1x32xf32>
    %93 = arith.addf %89, %92 : vector<1x32xf32>
    %94 = math.rsqrt %93 : vector<1x32xf32>
    %95 = vector.broadcast %94 : vector<1x32xf32> to vector<16x32xf32>
    %96 = arith.mulf %91, %95 : vector<16x32xf32>
    %97 = vector.broadcast %74 : vector<1x32xf32> to vector<16x32xf32>
    %98 = arith.addf %96, %97 : vector<16x32xf32>
    %cst_58 = arith.constant 0.000000e+00 : f32
    %99 = vector.broadcast %cst_58 : f32 to vector<16x32xf32>
    %100 = arith.maximumf %98, %99 : vector<16x32xf32>
    %101 = arith.addf %100, %69 : vector<16x32xf32>
    %c0_59 = arith.constant 0 : index
    %c0_60 = arith.constant 0 : index
    %102 = vector.load %arg19[%c0_59, %c0_60] : memref<16x32xf32, #tpu.memory_space<vmem>>, vector<16x32xf32>
    tpu.vector_store %arg19[%c0_59, %c0_60], %101 {strides = array<i32>} : memref<16x32xf32, #tpu.memory_space<vmem>>, vector<16x32xf32>,
    return
  }
  func.func @transform_0(%arg0: i32) -> (i32, i32) {
    %c0_i32 = arith.constant 0 : i32
    %c0_i32_0 = arith.constant 0 : i32
    %c0_i32_1 = arith.constant 0 : i32
    return %c0_i32, %c0_i32_0 : i32, i32
  }
  func.func @transform_1(%arg0: i32) -> (i32, i32) {
    %c0_i32 = arith.constant 0 : i32
    %c0_i32_0 = arith.constant 0 : i32
    %c0_i32_1 = arith.constant 0 : i32
    return %c0_i32, %c0_i32_0 : i32, i32
  }
  func.func @transform_2(%arg0: i32) -> (i32, i32) {
    %c0_i32 = arith.constant 0 : i32
    %c0_i32_0 = arith.constant 0 : i32
    %c0_i32_1 = arith.constant 0 : i32
    return %c0_i32, %c0_i32_0 : i32, i32
  }
  func.func @transform_3(%arg0: i32) -> (i32, i32) {
    %c0_i32 = arith.constant 0 : i32
    %c0_i32_0 = arith.constant 0 : i32
    %c0_i32_1 = arith.constant 0 : i32
    return %c0_i32, %c0_i32_0 : i32, i32
  }
  func.func @transform_4(%arg0: i32) -> (i32, i32) {
    %c0_i32 = arith.constant 0 : i32
    %c0_i32_0 = arith.constant 0 : i32
    %c0_i32_1 = arith.constant 0 : i32
    return %c0_i32, %c0_i32_0 : i32, i32
  }
  func.func @transform_5(%arg0: i32) -> (i32, i32) {
    %c0_i32 = arith.constant 0 : i32
    %c0_i32_0 = arith.constant 0 : i32
    %c0_i32_1 = arith.constant 0 : i32
    return %c0_i32, %c0_i32_0 : i32, i32
  }
  func.func @transform_6(%arg0: i32) -> (i32, i32) {
    %c0_i32 = arith.constant 0 : i32
    %c0_i32_0 = arith.constant 0 : i32
    %c0_i32_1 = arith.constant 0 : i32
    return %c0_i32, %c0_i32_0 : i32, i32
  }
  func.func @transform_7(%arg0: i32) -> (i32, i32) {
    %c0_i32 = arith.constant 0 : i32
    %c0_i32_0 = arith.constant 0 : i32
    %c0_i32_1 = arith.constant 0 : i32
    return %c0_i32, %c0_i32_0 : i32, i32
  }
  func.func @transform_8(%arg0: i32) -> (i32, i32) {
    %c0_i32 = arith.constant 0 : i32
    %c0_i32_0 = arith.constant 0 : i32
    %c0_i32_1 = arith.constant 0 : i32
    return %c0_i32, %c0_i32_0 : i32, i32
  }
  func.func @transform_9(%arg0: i32) -> (i32, i32) {
    %c0_i32 = arith.constant 0 : i32
    %c0_i32_0 = arith.constant 0 : i32
    %c0_i32_1 = arith.constant 0 : i32
    return %c0_i32, %c0_i32_0 : i32, i32
  }
  func.func @transform_10(%arg0: i32) -> (i32, i32) {
    %c0_i32 = arith.constant 0 : i32
    %c0_i32_0 = arith.constant 0 : i32
    %c0_i32_1 = arith.constant 0 : i32
    return %c0_i32, %c0_i32_0 : i32, i32
  }
  func.func @transform_11(%arg0: i32) -> (i32, i32) {
    %c0_i32 = arith.constant 0 : i32
    %c0_i32_0 = arith.constant 0 : i32
    %c0_i32_1 = arith.constant 0 : i32
    return %c0_i32, %c0_i32_0 : i32, i32
  }
  func.func @transform_12(%arg0: i32) -> (i32, i32) {
    %c0_i32 = arith.constant 0 : i32
    %c0_i32_0 = arith.constant 0 : i32
    %c0_i32_1 = arith.constant 0 : i32
    return %c0_i32, %c0_i32_0 : i32, i32
  }
  func.func @transform_13(%arg0: i32) -> (i32, i32) {
    %c0_i32 = arith.constant 0 : i32
    %c0_i32_0 = arith.constant 0 : i32
    %c0_i32_1 = arith.constant 0 : i32
    return %c0_i32, %c0_i32_0 : i32, i32
  }
  func.func @transform_14(%arg0: i32) -> (i32, i32) {
    %c0_i32 = arith.constant 0 : i32
    %c0_i32_0 = arith.constant 0 : i32
    %c0_i32_1 = arith.constant 0 : i32
    return %c0_i32, %c0_i32_0 : i32, i32
  }
  func.func @transform_15(%arg0: i32) -> (i32, i32) {
    %c0_i32 = arith.constant 0 : i32
    %c0_i32_0 = arith.constant 0 : i32
    %c0_i32_1 = arith.constant 0 : i32
    return %c0_i32, %c0_i32_0 : i32, i32
  }
  func.func @transform_16(%arg0: i32) -> (i32, i32) {
    %c0_i32 = arith.constant 0 : i32
    %c0_i32_0 = arith.constant 0 : i32
    %c0_i32_1 = arith.constant 0 : i32
    return %c0_i32, %c0_i32_0 : i32, i32
  }
  func.func @transform_17(%arg0: i32) -> (i32, i32) {
    %c0_i32 = arith.constant 0 : i32
    %c0_i32_0 = arith.constant 0 : i32
    %c0_i32_1 = arith.constant 0 : i32
    return %c0_i32, %c0_i32_0 : i32, i32
  }
  func.func @transform_18(%arg0: i32) -> (i32, i32) {
    %c0_i32 = arith.constant 0 : i32
    %c0_i32_0 = arith.constant 0 : i32
    %c0_i32_1 = arith.constant 0 : i32
    return %c0_i32, %c0_i32_0 : i32, i32
  }
}

</mosaic_0001>

<bundles_post_ra>
// kernel: tpu_custom_call.1
= control target key start
LH: loop header
LB: loop body
LE: loop exit
PB: predicated region body
PF: predicated region fallthrough
CT: control target
= control target key end

     0   :  { %s1506_s0 = inlined_call_operand.vmem [shape: f32[16,4], index: 0, kind: input, shape index: {}]   ;;  %s1507_s1 = inlined_call_operand.hbm [shape: f32[16,16], index: 1, kind: input, shape index: {}]   ;;  %s1508_s2 = inlined_call_operand.hbm [shape: f32[4,32], index: 2, kind: input, shape index: {}]   ;;  %s1509_s3 = inlined_call_operand.vmem [shape: f32[1,32], index: 3, kind: input, shape index: {}]   ;;  %s1510_s4 = inlined_call_operand.hbm [shape: f32[4,32], index: 4, kind: input, shape index: {}]   ;;  %s1511_s5 = inlined_call_operand.vmem [shape: f32[1,32], index: 5, kind: input, shape index: {}]   ;;  %s1512_s6 = inlined_call_operand.hbm [shape: f32[1,32], index: 6, kind: input, shape index: {}]   ;;  %s1513_s7 = inlined_call_operand.hbm [shape: f32[1,32], index: 7, kind: input, shape index: {}]   ;;  %s1514_s8 = inlined_call_operand.vmem [shape: f32[32,32], index: 8, kind: input, shape index: {}]   ;;  %s1515_s9 = inlined_call_operand.vmem [shape: f32[1,32], index: 9, kind: input, shape index: {}]   ;;  %s1516_s10 = inlined_call_operand.vmem [shape: f32[1,32], index: 10, kind: input, shape index: {}]   ;;  %s1517_s11 = inlined_call_operand.vmem [shape: f32[1,32], index: 11, kind: input, shape index: {}]   ;;  %s1518_s12 = inlined_call_operand.hbm [shape: f32[32,32], index: 12, kind: input, shape index: {}]   ;;  %s1519_s13 = inlined_call_operand.vmem [shape: f32[1,32], index: 13, kind: input, shape index: {}]   ;;  %s1520_s14 = inlined_call_operand.vmem [shape: f32[1,32], index: 14, kind: input, shape index: {}]   ;;  %s1521_s15 = inlined_call_operand.vmem [shape: f32[1,32], index: 15, kind: input, shape index: {}]   ;;  %s1522_s16 = inlined_call_operand.hbm [shape: f32[16,32], index: 16, kind: output, shape index: {0}]   ;;  %s1523_s17 = inlined_call_operand.hbm [shape: f32[16,32], index: 17, kind: output, shape index: {1}]   ;;  %s1524_s18 = inlined_call_operand.hbm [shape: f32[16,32], index: 18, kind: output, shape index: {2}]  }
   0x1   :  { %1526 = sst [smem:[#allocation23_spill]] %s1506_s0 }
   0x2   :  { %1527 = sst [smem:[#allocation24_spill]] %s1507_s1 }
   0x3   :  { %1528 = sst [smem:[#allocation25_spill]] %s1508_s2 }
   0x4   :  { %24 = vsyncpa [#allocation3], 0 }
   0x5   :  { %25 = vsyncpa [#allocation6], 0 }
   0x6   :  { %26 = vsyncpa [#allocation9], 0 }
   0x7   :  { %27 = vsyncpa [#allocation12], 0 }
   0x8   :  { %28 = vsyncpa [#allocation4], 0 }
   0x9   :  { %29 = vsyncpa [#allocation15], 0  ;;  %s1258_s27 = smov [#allocation5]   ;;  %s1259_s29 = smov [#allocation8]  }
   0xa   :  { %s50_s28 = sshll.u32 %s1258_s27, 4  ;;  %s74_s30 = sshll.u32 %s1259_s29, 4  ;;  %s51_s28 = int_to_ptr.vmem [resolvable:$true] %s50_s28  ;;  %s75_s30 = int_to_ptr.vmem [resolvable:$true] %s74_s30 }
   0xb   :  { %s1074_s0 = scalar_lea.vmem %s51_s28, 64  ;;  %p1079_p1 = scmp.lt.s32.totalorder %s51_s28, %s51_s28 }
   0xc   :  { %p1075_p0 = scmp.ne.s32.totalorder %s51_s28, %s1074_s0  ;;  %p1080_p2 = scmp.lt.s32.totalorder %s1074_s0, %s1074_s0 }
   0xe   :  { %p1081_p3 = por %p1080_p2, %p1079_p1 }
  0x10   :  { %p1082_p4 = pnand %p1081_p3, %p1075_p0 }
  0x12   :  { %1085 = shalt.err (!%p1082_p4)
}
  0x13   :  { %s1529_s20 = sld [smem:[#allocation25_spill]]  ;;  %s1094_s21 = scalar_lea.vmem %s75_s30, 16 }
  0x14   :  { %p1095_p5 = scmp.ne.s32.totalorder %s75_s30, %s1094_s21  ;;  %s1098_s22 = scalar_lea.vmem %s75_s30, 32 }
  0x15   :  { %p1099_p6 = scmp.lt.s32.totalorder %s75_s30, %s75_s30  ;;  %p1100_p7 = scmp.lt.s32.totalorder %s1098_s22, %s1094_s21 }
  0x17   :  { %p1101_p8 = por %p1100_p7, %p1099_p6 }
  0x19   :  { %53 = dma.hbm_to_vmem [thread:$0]  %s1529_s20, 64, %s51_s28, [#allocation6]  }
  0x1a   :  { %p1102_p9 = pnand %p1101_p8, %p1095_p5 }
  0x1c   :  { %1105 = shalt.err (!%p1102_p9)
}
  0x1d   :  { %77 = dma.hbm_to_vmem [thread:$0]  %s1512_s6, 16, %s75_s30, [#allocation9]  }
  0x1e   :  { %s1260_s24 = smov [#allocation2]  }
  0x1f   :  { %s37_s25 = sshll.u32 %s1260_s24, 4  ;;  %s38_s25 = int_to_ptr.vmem [resolvable:$true] %s37_s25 }
  0x20   :  { %s1114_s26 = scalar_lea.vmem %s38_s25, 256  ;;  %p1119_p11 = scmp.lt.s32.totalorder %s38_s25, %s38_s25 }
  0x21   :  { %p1115_p10 = scmp.ne.s32.totalorder %s38_s25, %s1114_s26  ;;  %p1120_p12 = scmp.lt.s32.totalorder %s1114_s26, %s1114_s26 }
  0x23   :  { %p1121_p13 = por %p1120_p12, %p1119_p11 }
  0x25   :  { %p1122_p0 = pnand %p1121_p13, %p1115_p10 }
  0x27   :  { %1125 = shalt.err (!%p1122_p0)
}
  0x28   :  { %s1261_s27 = smov 128   ;;  %s1262_s28 = smov 8  }
  0x29   :  { %s1530_s19 = sld [smem:[#allocation24_spill]]  ;;  %s1263_s6 = smov [#allocation7]  }
  0x2a   :  { %s62_s30 = sshll.u32 %s1263_s6, 4  ;;  %s1264_s1 = smov [#allocation10]   ;;  %s63_s30 = int_to_ptr.vmem [resolvable:$true] %s62_s30 }
  0x2b   :  { %s84_s20 = sshll.u32 %s1264_s1, 4  ;;  %s1134_s21 = scalar_lea.vmem %s63_s30, 64  ;;  %s85_s20 = int_to_ptr.vmem [resolvable:$true] %s84_s20 }
  0x2c   :  { %p1135_p1 = scmp.ne.s32.totalorder %s63_s30, %s1134_s21  ;;  %p1139_p2 = scmp.lt.s32.totalorder %s63_s30, %s63_s30 }
  0x2d   :  { %p1140_p3 = scmp.lt.s32.totalorder %s1134_s21, %s1134_s21 }
  0x2f   :  { %43 = dma.hbm_to_vmem [thread:$0]  %s1530_s19, 256, %s38_s25, [#allocation3], %s1261_s27, %s1261_s27, %s1262_s28  }
  0x30   :  { %p1141_p4 = por %p1140_p3, %p1139_p2 }
  0x32   :  { %p1142_p5 = pnand %p1141_p4, %p1135_p1 }
  0x34   :  { %1145 = shalt.err (!%p1142_p5)
}
  0x35   :  { %65 = dma.hbm_to_vmem [thread:$0]  %s1510_s4, 64, %s63_s30, [#allocation6]  }
  0x36   :  { %s1154_s23 = scalar_lea.vmem %s85_s20, 16  ;;  %s1158_s24 = scalar_lea.vmem %s85_s20, 32 }
  0x37   :  { %p1155_p6 = scmp.ne.s32.totalorder %s85_s20, %s1154_s23  ;;  %p1159_p7 = scmp.lt.s32.totalorder %s85_s20, %s85_s20 }
  0x38   :  { %p1160_p8 = scmp.lt.s32.totalorder %s1158_s24, %s1154_s23 }
  0x3a   :  { %p1161_p9 = por %p1160_p8, %p1159_p7 }
  0x3c   :  { %p1162_p10 = pnand %p1161_p9, %p1155_p6 }
  0x3e   :  { %1165 = shalt.err (!%p1162_p10)
}
  0x3f   :  { %87 = dma.hbm_to_vmem [thread:$0]  %s1513_s7, 16, %s85_s20, [#allocation9]  }
  0x40   :  { %s1265_s29 = smov [#allocation11]  }
  0x41   :  { %s101_s0 = sshll.u32 %s1265_s29, 4  ;;  %s102_s0 = int_to_ptr.vmem [resolvable:$true] %s101_s0 }
  0x42   :  { %s1174_s19 = scalar_lea.vmem %s102_s0, 512  ;;  %p1179_p12 = scmp.lt.s32.totalorder %s102_s0, %s102_s0 }
  0x43   :  { %p1175_p11 = scmp.ne.s32.totalorder %s102_s0, %s1174_s19  ;;  %p1180_p13 = scmp.lt.s32.totalorder %s1174_s19, %s1174_s19 }
  0x45   :  { %p1181_p0 = por %p1180_p13, %p1179_p12 }
  0x47   :  { %p1182_p1 = pnand %p1181_p0, %p1175_p11 }
  0x49   :  { %1185 = shalt.err (!%p1182_p1)
}
  0x4a   :  { %107 = dma.hbm_to_vmem [thread:$0]  %s1518_s12, 512, %s102_s0, [#allocation12], %s1261_s27, %s1261_s27, %s1262_s28  }
  0x4b   :  { %1246 = dma.done.wait [#allocation3], 256  }
  0x4c   :  { %1247 = vsyncadd [#allocation3], 4294967040 }
  0x4d   :  { %1248 = dma.done.wait [#allocation6], 128  }
  0x4e   :  { %1249 = vsyncadd [#allocation6], 4294967168 }
  0x4f   :  { %1250 = dma.done.wait [#allocation9], 32  }
  0x50   :  { %1251 = vsyncadd [#allocation9], 4294967264 }
  0x51   :  { %1252 = dma.done.wait [#allocation12], 512  }
  0x52   :  { %1253 = vsyncadd [#allocation12], 4294966784  ;;  %vm151_vm0 = vcmask 1043456   ;;  %vm144_vm1 = vcmask 31744   ;;  %v230_v0 = vld [vmem:[#allocation7] sm:$0xf] }
  0x53   :  { %s1531_s1 = sld [smem:[#allocation23_spill]]  ;;  %1001 = vmatprep.subr.msk.mxu1 %vm151_vm0, %v230_v0  ;;  %v136_v3 = vld [vmem:[#allocation5] sm:$0xf]  ;;  %v1394_v4 = vld [vmem:[#allocation2] sm:$0xff]  ;;  %vm318_vm2 = vcmask 130048   ;;  %v1398_v7 = vld [vmem:[#allocation2 + $0x8] sm:$0xff] }
  0x54   :  { %1002 = vmatpush3.msk.msra.mxu1 %vm151_vm0, %v230_v0  ;;  %996 = vmatprep.subr.msk.mxu0 %vm151_vm0, %v136_v3  ;;  %v454_v8 = vld [vmem:[%s1514_s8 + $0x18] sm:$0xff]  ;;  %v453_v9 = vld [vmem:[%s1514_s8 + $0x10] sm:$0xff]  ;;  %v452_v10 = vld [vmem:[%s1514_s8 + $0x8] sm:$0xff]  ;;  %vm400_vm3 = vcmask 261120  }
  0x55   :  { %997 = vmatpush3.msk.msra.mxu0 %vm151_vm0, %v136_v3  ;;  %1013 = vmatprep.subr.mxu1 %v454_v8  ;;  %v451_v11 = vld [vmem:[%s1514_s8] sm:$0xff]  ;;  %v950_v44 = vld [vmem:[#allocation8] ss:$0 sm:$0xff]  ;;  %v951_v48 = vld [vmem:[#allocation10] ss:$0 sm:$0xff] }
  0x56   :  { %v947_v14 = vld [vmem:[%s1511_s5] ss:$0 sm:$0xff]  ;;  %v673_v62 = vld [vmem:[#allocation11 + $0x18] sm:$0xff]  ;;  %v672_v63 = vld [vmem:[#allocation11 + $0x10] sm:$0xff] }
  0x57   :  { %v940_v51 = vld [vmem:[%s1509_s3] ss:$0 sm:$0xff]  ;;  %v671_v0 = vld [vmem:[#allocation11 + $0x8] sm:$0xff] }
  0x59   :  { %v132_v1 = vld [vmem:[%s1531_s1] sm:$0xff]  ;;  %v133_v2 = vld [vmem:[%s1531_s1 + $0x8] sm:$0xff]  ;;  %s1267_s1 = smov [#allocation13]  }
  0x5a   :  { %1003 = vmatprep.mubr.msk.f32.mxu1 %vm144_vm1, %v132_v1  ;;  %998 = vmatprep.mubr.msk.f32.mxu0 %vm144_vm1, %v132_v1  ;;  %v670_v1 = vld [vmem:[#allocation11] sm:$0xff]  ;;  %s894_s20 = sshll.u32 %s1267_s1, 4  ;;  %s895_s20 = int_to_ptr.vmem [resolvable:$true] %s894_s20 }
  0x5b   :  { %1004 = vmatmul.mubr.msk.f32.vlgmr.msra.gmra.mxu1 %vm144_vm1, %v133_v2  ;;  %999 = vmatmul.mubr.msk.f32.vlgmr.msra.gmra.mxu0 %vm144_vm1, %v133_v2  ;;  %v954_v2 = vld [vmem:[%s1515_s9] ss:$0 sm:$0xff] }
  0x5c   :  { %1010 = vmatprep.mubr.msk.f32.mxu0 %vm318_vm2, %v1394_v4  ;;  %1014 = vmatpush3.msra.mxu1 %v454_v8 }
  0x5d   :  { %1015 = vmatprep.subr.mxu1 %v453_v9 }
  0x5e   :  { %1016 = vmatpush3.msra.mxu1 %v453_v9 }
  0x5f   :  { %1017 = vmatprep.subr.mxu1 %v452_v10 }
  0x60   :  { %1018 = vmatpush3.msra.mxu1 %v452_v10 }
  0x61   :  { %1019 = vmatprep.subr.mxu1 %v451_v11 }
  0x62   :  { %1020 = vmatpush3.msra.mxu1 %v451_v11 }
 0x11b   :  { %v1005_v5 = vpop.f32.mrf.mxu1  ;;  %v1000_v12 = vpop.f32.mrf.mxu0 }
 0x11c   :  { %1006 = vmatprep.subr.mxu0 %v1005_v5  ;;  %v227_v54 = vadd.f32 %v1000_v12, %v940_v51 }
 0x11d   :  { %v303_v6 = vpop.f32.mrf.mxu1  ;;  %1007 = vmatpush3.msra.mxu0 %v1005_v5  ;;  %v221_v13 = vpop.f32.mrf.mxu0 }
 0x11e   :  { %1008 = vmatprep.subr.mxu0 %v303_v6  ;;  %v222_v55 = vadd.f32 %v940_v51, %v221_v13 }
 0x11f   :  { %1009 = vmatpush3.msra.mxu0 %v303_v6 }
 0x120   :  { %1011 = vmatmul.mubr.msk.f32.vlgmr.msra.gmra.mxu0 %vm318_vm2, %v1398_v7 }
 0x121   :  { %1028 = vmatprep.mubr.msk.f32.mxu0 %vm318_vm2, %v1394_v4 }
 0x1e0   :  { %v1012_v15 = vpop.f32.mrf.mxu0 }
 0x1e1   :  { %v397_v16 = vadd.f32 %v1012_v15, %v947_v14 }
 0x1e2   :  { %v391_v17 = vpop.f32.mrf.mxu0 }
 0x1e3   :  { %v392_v18 = vadd.f32 %v947_v14, %v391_v17  ;;  %v402_v19 = vsel %vm400_vm3, %v397_v16, 0.0 }
 0x1e5   :  { %v401_v20 = vsel %vm400_vm3, %v392_v18, 0.0 }
 0x1e6   :  { %v403_v21 = vadd.f32 %v402_v19, %v401_v20 }
 0x1e8   :  { %v404_v22 = vrot.slane %v403_v21, 4 }
 0x1ea   :  { %v405_v23 = vadd.f32 %v404_v22, %v403_v21 }
 0x1ec   :  { %v406_v24 = vrot.slane %v405_v23, 2 }
 0x1ee   :  { %v407_v25 = vadd.f32 %v406_v24, %v405_v23 }
 0x1f0   :  { %v408_v26 = vrot.slane %v407_v25, 1 }
 0x1f2   :  { %v409_v27 = vadd.f32 %v408_v26, %v407_v25 }
 0x1f4   :  { %v410_v28 = vmul.f32 0.0625, %v409_v27 }
 0x1f6   :  { %v411_v29 = vsub.f32 %v392_v18, %v410_v28  ;;  %v412_v30 = vsub.f32 %v397_v16, %v410_v28 }
 0x1f8   :  { %v413_v31 = vmul.f32 %v411_v29, %v411_v29  ;;  %v414_v32 = vmul.f32 %v412_v30, %v412_v30  ;;  %v431_v45 = vmul.f32 %v950_v44, %v411_v29  ;;  %v432_v46 = vmul.f32 %v950_v44, %v412_v30 }
 0x1fa   :  { %v415_v33 = vsel %vm400_vm3, %v413_v31, 0.0  ;;  %v416_v34 = vsel %vm400_vm3, %v414_v32, 0.0 }
 0x1fb   :  { %v417_v35 = vadd.f32 %v416_v34, %v415_v33  ;;  %v957_v33 = vld [vmem:[%s1516_s10] ss:$0 sm:$0xff]  ;;  %s1266_s10 = smov [#allocation14]  }
 0x1fd   :  { %v418_v36 = vrot.slane %v417_v35, 4 }
 0x1ff   :  { %v419_v37 = vadd.f32 %v418_v36, %v417_v35 }
 0x201   :  { %v420_v38 = vrot.slane %v419_v37, 2 }
 0x203   :  { %v421_v39 = vadd.f32 %v420_v38, %v419_v37  ;;  %v958_v37 = vld [vmem:[%s1517_s11] ss:$0 sm:$0xff]  ;;  %s906_s11 = sshll.u32 %s1266_s10, 4  ;;  %s907_s11 = int_to_ptr.vmem [resolvable:$true] %s906_s11 }
 0x204   :  { %s1186_s21 = scalar_lea.vmem %s907_s11, 256  ;;  %p1191_p3 = scmp.lt.s32.totalorder %s907_s11, %s907_s11 }
 0x205   :  { %v422_v40 = vrot.slane %v421_v39, 1  ;;  %p1187_p2 = scmp.ne.s32.totalorder %s907_s11, %s1186_s21  ;;  %p1192_p4 = scmp.lt.s32.totalorder %s1186_s21, %s1186_s21 }
 0x207   :  { %v423_v41 = vadd.f32 %v422_v40, %v421_v39  ;;  %p1193_p5 = por %p1192_p4, %p1191_p3 }
 0x209   :  { %v424_v42 = vmul.f32 0.0625, %v423_v41  ;;  %p1194_p6 = pnand %p1193_p5, %p1187_p2 }
 0x20b   :  { %v433_v43 = vadd.f32 1e-05, %v424_v42 }
 0x20d   :  { %1060 = vrsqrt.f32 %v433_v43 }
 0x21a   :  { %v1061_v47 = vpop.eup %1060 }
 0x21b   :  { %v435_v49 = vmul.f32 %v1061_v47, %v431_v45  ;;  %v436_v50 = vmul.f32 %v1061_v47, %v432_v46 }
 0x21d   :  { %v443_v52 = vadd.f32 %v951_v48, %v435_v49  ;;  %v444_v53 = vadd.f32 %v951_v48, %v436_v50 }
 0x21f   :  { %v445_v56 = vmax.f32 %v443_v52, 0.0  ;;  %v446_v57 = vmax.f32 %v444_v53, 0.0 }
 0x221   :  { %v1426_v58 = vadd.f32 %v445_v56, %v222_v55  ;;  %v1428_v59 = vadd.f32 %v446_v57, %v227_v54 }
 0x223   :  { %1021 = vmatprep.mubr.msk.f32.mxu1 %vm400_vm3, %v1426_v58  ;;  %449 = vst.msk [vmem:[#allocation13] sm:$0xff] %vm400_vm3, %v1426_v58  ;;  %450 = vst.msk [vmem:[#allocation13 + $0x8] sm:$0xff] %vm400_vm3, %v1428_v59 }
 0x224   :  { %1022 = vmatmul.mubr.msk.f32.vlgmr.msra.gmra.mxu1 %vm400_vm3, %v1428_v59 }
 0x225   :  { %1046 = vmatprep.mubr.msk.f32.mxu1 %vm318_vm2, %v1394_v4 }
 0x2e4   :  { %v1023_v60 = vpop.f32.mrf.mxu1 }
 0x2e5   :  { %1024 = vmatprep.subr.mxu0 %v1023_v60 }
 0x2e6   :  { %v530_v61 = vpop.f32.mrf.mxu1  ;;  %1025 = vmatpush3.msra.mxu0 %v1023_v60 }
 0x2e7   :  { %1026 = vmatprep.subr.mxu0 %v530_v61 }
 0x2e8   :  { %1027 = vmatpush3.msra.mxu0 %v530_v61 }
 0x2e9   :  { %1029 = vmatmul.mubr.msk.f32.vlgmr.msra.gmra.mxu0 %vm318_vm2, %v1398_v7  ;;  %1031 = vmatprep.subr.mxu0 %v673_v62 }
 0x2ea   :  { %1032 = vmatpush3.msra.mxu0 %v673_v62 }
 0x2eb   :  { %1033 = vmatprep.subr.mxu0 %v672_v63 }
 0x2ec   :  { %1034 = vmatpush3.msra.mxu0 %v672_v63 }
 0x2ed   :  { %1035 = vmatprep.subr.mxu0 %v671_v0 }
 0x2ee   :  { %1036 = vmatpush3.msra.mxu0 %v671_v0 }
 0x2ef   :  { %1037 = vmatprep.subr.mxu0 %v670_v1 }
 0x2f0   :  { %1038 = vmatpush3.msra.mxu0 %v670_v1 }
 0x3a9   :  { %v1030_v3 = vpop.f32.mrf.mxu0 }
 0x3aa   :  { %v617_v4 = vadd.f32 %v1030_v3, %v954_v2 }
 0x3ab   :  { %v611_v5 = vpop.f32.mrf.mxu0 }
 0x3ac   :  { %v612_v6 = vadd.f32 %v954_v2, %v611_v5  ;;  %v621_v8 = vsel %vm400_vm3, %v617_v4, 0.0 }
 0x3ae   :  { %v620_v9 = vsel %vm400_vm3, %v612_v6, 0.0 }
 0x3af   :  { %v622_v10 = vadd.f32 %v621_v8, %v620_v9 }
 0x3b1   :  { %v623_v11 = vrot.slane %v622_v10, 4 }
 0x3b3   :  { %v624_v12 = vadd.f32 %v623_v11, %v622_v10 }
 0x3b5   :  { %v625_v13 = vrot.slane %v624_v12, 2 }
 0x3b7   :  { %v626_v14 = vadd.f32 %v625_v13, %v624_v12 }
 0x3b9   :  { %v627_v15 = vrot.slane %v626_v14, 1 }
 0x3bb   :  { %v628_v16 = vadd.f32 %v627_v15, %v626_v14 }
 0x3bd   :  { %v629_v17 = vmul.f32 0.0625, %v628_v16 }
 0x3bf   :  { %v630_v18 = vsub.f32 %v612_v6, %v629_v17  ;;  %v631_v19 = vsub.f32 %v617_v4, %v629_v17 }
 0x3c1   :  { %v632_v20 = vmul.f32 %v630_v18, %v630_v18  ;;  %v633_v21 = vmul.f32 %v631_v19, %v631_v19  ;;  %v650_v34 = vmul.f32 %v957_v33, %v630_v18  ;;  %v651_v35 = vmul.f32 %v957_v33, %v631_v19 }
 0x3c3   :  { %v634_v22 = vsel %vm400_vm3, %v632_v20, 0.0  ;;  %v635_v23 = vsel %vm400_vm3, %v633_v21, 0.0 }
 0x3c4   :  { %v636_v24 = vadd.f32 %v635_v23, %v634_v22 }
 0x3c6   :  { %v637_v25 = vrot.slane %v636_v24, 4 }
 0x3c8   :  { %v638_v26 = vadd.f32 %v637_v25, %v636_v24 }
 0x3ca   :  { %v639_v27 = vrot.slane %v638_v26, 2 }
 0x3cc   :  { %v640_v28 = vadd.f32 %v639_v27, %v638_v26 }
 0x3ce   :  { %v641_v29 = vrot.slane %v640_v28, 1 }
 0x3d0   :  { %v642_v30 = vadd.f32 %v641_v29, %v640_v28 }
 0x3d2   :  { %v643_v31 = vmul.f32 0.0625, %v642_v30 }
 0x3d4   :  { %v652_v32 = vadd.f32 1e-05, %v643_v31 }
 0x3d6   :  { %1062 = vrsqrt.f32 %v652_v32 }
 0x3e3   :  { %v1063_v36 = vpop.eup %1062 }
 0x3e4   :  { %v654_v38 = vmul.f32 %v1063_v36, %v650_v34  ;;  %v655_v39 = vmul.f32 %v1063_v36, %v651_v35 }
 0x3e6   :  { %v662_v40 = vadd.f32 %v958_v37, %v654_v38  ;;  %v663_v41 = vadd.f32 %v958_v37, %v655_v39 }
 0x3e8   :  { %v664_v42 = vmax.f32 %v662_v40, 0.0  ;;  %v665_v43 = vmax.f32 %v663_v41, 0.0 }
 0x3ea   :  { %v1456_v44 = vadd.f32 %v664_v42, %v1426_v58  ;;  %v1459_v45 = vadd.f32 %v665_v43, %v1428_v59 }
 0x3ec   :  { %1039 = vmatprep.mubr.msk.f32.mxu0 %vm400_vm3, %v1456_v44  ;;  %668 = vst.msk [vmem:[#allocation14] sm:$0xff] %vm400_vm3, %v1456_v44  ;;  %669 = vst.msk [vmem:[#allocation14 + $0x8] sm:$0xff] %vm400_vm3, %v1459_v45 }
 0x3ed   :  { %1040 = vmatmul.mubr.msk.f32.vlgmr.msra.gmra.mxu0 %vm400_vm3, %v1459_v45 }
 0x4ad   :  { %v1041_v46 = vpop.f32.mrf.mxu0 }
 0x4ae   :  { %1042 = vmatprep.subr.mxu1 %v1041_v46 }
 0x4af   :  { %v749_v47 = vpop.f32.mrf.mxu0  ;;  %1043 = vmatpush3.msra.mxu1 %v1041_v46 }
 0x4b0   :  { %1044 = vmatprep.subr.mxu1 %v749_v47 }
 0x4b1   :  { %1045 = vmatpush3.msra.mxu1 %v749_v47 }
 0x4b2   :  { %1047 = vmatmul.mubr.msk.f32.vlgmr.msra.gmra.mxu1 %vm318_vm2, %v1398_v7 }
 0x4b3   :  { %1197 = shalt.err (!%p1194_p6)
}
 0x4b4   :  { %912 = dma.vmem_to_hbm [thread:$0]  %s907_s11, 256, %s1523_s17, [#allocation15], %s1261_s27, %s1261_s27, %s1262_s28  }
 0x4b5   :  { %s1206_s2 = scalar_lea.vmem %s895_s20, 256  ;;  %p1211_p8 = scmp.lt.s32.totalorder %s895_s20, %s895_s20 }
 0x4b6   :  { %p1207_p7 = scmp.ne.s32.totalorder %s895_s20, %s1206_s2  ;;  %p1212_p9 = scmp.lt.s32.totalorder %s1206_s2, %s1206_s2 }
 0x4b8   :  { %p1213_p10 = por %p1212_p9, %p1211_p8 }
 0x4ba   :  { %p1214_p11 = pnand %p1213_p10, %p1207_p7 }
 0x4bc   :  { %1217 = shalt.err (!%p1214_p11)
}
 0x4bd   :  { %900 = dma.vmem_to_hbm [thread:$0]  %s895_s20, 256, %s1522_s16, [#allocation4], %s1261_s27, %s1261_s27, %s1262_s28  }
 0x4be   :  { %v961_v7 = vld [vmem:[%s1519_s13] ss:$0 sm:$0xff]  ;;  %s1268_s0 = smov [#allocation16]  }
 0x4bf   :  { %v964_v14 = vld [vmem:[%s1520_s14] ss:$0 sm:$0xff]  ;;  %s918_s19 = sshll.u32 %s1268_s0, 4  ;;  %s919_s19 = int_to_ptr.vmem [resolvable:$true] %s918_s19 }
 0x4c0   :  { %v965_v18 = vld [vmem:[%s1521_s15] ss:$0 sm:$0xff]  ;;  %s1226_s14 = scalar_lea.vmem %s919_s19, 256  ;;  %p1231_p13 = scmp.lt.s32.totalorder %s919_s19, %s919_s19 }
 0x4c1   :  { %p1227_p12 = scmp.ne.s32.totalorder %s919_s19, %s1226_s14  ;;  %p1232_p0 = scmp.lt.s32.totalorder %s1226_s14, %s1226_s14 }
 0x4c3   :  { %p1233_p1 = por %p1232_p0, %p1231_p13 }
 0x4c5   :  { %p1234_p2 = pnand %p1233_p1, %p1227_p12 }
 0x572   :  { %v1048_v48 = vpop.f32.mrf.mxu1 }
 0x573   :  { %v836_v49 = vadd.f32 %v1048_v48, %v961_v7 }
 0x574   :  { %v830_v50 = vpop.f32.mrf.mxu1 }
 0x575   :  { %v831_v51 = vadd.f32 %v961_v7, %v830_v50  ;;  %v840_v52 = vsel %vm400_vm3, %v836_v49, 0.0 }
 0x577   :  { %v839_v53 = vsel %vm400_vm3, %v831_v51, 0.0 }
 0x578   :  { %v841_v54 = vadd.f32 %v840_v52, %v839_v53 }
 0x57a   :  { %v842_v55 = vrot.slane %v841_v54, 4 }
 0x57c   :  { %v843_v56 = vadd.f32 %v842_v55, %v841_v54 }
 0x57e   :  { %v844_v57 = vrot.slane %v843_v56, 2 }
 0x580   :  { %v845_v58 = vadd.f32 %v844_v57, %v843_v56 }
 0x582   :  { %v846_v59 = vrot.slane %v845_v58, 1 }
 0x584   :  { %v847_v60 = vadd.f32 %v846_v59, %v845_v58 }
 0x586   :  { %v848_v61 = vmul.f32 0.0625, %v847_v60 }
 0x588   :  { %v849_v62 = vsub.f32 %v831_v51, %v848_v61  ;;  %v850_v63 = vsub.f32 %v836_v49, %v848_v61 }
 0x58a   :  { %v851_v0 = vmul.f32 %v849_v62, %v849_v62  ;;  %v852_v1 = vmul.f32 %v850_v63, %v850_v63  ;;  %v869_v15 = vmul.f32 %v964_v14, %v849_v62  ;;  %v870_v16 = vmul.f32 %v964_v14, %v850_v63 }
 0x58c   :  { %v853_v2 = vsel %vm400_vm3, %v851_v0, 0.0  ;;  %v854_v3 = vsel %vm400_vm3, %v852_v1, 0.0 }
 0x58d   :  { %v855_v4 = vadd.f32 %v854_v3, %v853_v2 }
 0x58f   :  { %v856_v5 = vrot.slane %v855_v4, 4 }
 0x591   :  { %v857_v6 = vadd.f32 %v856_v5, %v855_v4 }
 0x593   :  { %v858_v8 = vrot.slane %v857_v6, 2 }
 0x595   :  { %v859_v9 = vadd.f32 %v858_v8, %v857_v6 }
 0x597   :  { %v860_v10 = vrot.slane %v859_v9, 1 }
 0x599   :  { %v861_v11 = vadd.f32 %v860_v10, %v859_v9 }
 0x59b   :  { %v862_v12 = vmul.f32 0.0625, %v861_v11 }
 0x59d   :  { %v871_v13 = vadd.f32 1e-05, %v862_v12 }
 0x59f   :  { %1064 = vrsqrt.f32 %v871_v13 }
 0x5ac   :  { %v1065_v17 = vpop.eup %1064 }
 0x5ad   :  { %v873_v19 = vmul.f32 %v1065_v17, %v869_v15  ;;  %v874_v20 = vmul.f32 %v1065_v17, %v870_v16 }
 0x5af   :  { %v881_v21 = vadd.f32 %v965_v18, %v873_v19  ;;  %v882_v22 = vadd.f32 %v965_v18, %v874_v20 }
 0x5b1   :  { %v883_v23 = vmax.f32 %v881_v21, 0.0  ;;  %v884_v24 = vmax.f32 %v882_v22, 0.0 }
 0x5b3   :  { %v885_v25 = vadd.f32 %v883_v23, %v1456_v44  ;;  %v886_v26 = vadd.f32 %v884_v24, %v1459_v45 }
 0x5b5   :  { %887 = vst.msk [vmem:[#allocation16] sm:$0xff] %vm400_vm3, %v885_v25  ;;  %888 = vst.msk [vmem:[#allocation16 + $0x8] sm:$0xff] %vm400_vm3, %v886_v26 }
 0x5b6   :  { %1237 = shalt.err (!%p1234_p2)
}
 0x5b7   :  { %924 = dma.vmem_to_hbm [thread:$0]  %s919_s19, 256, %s1524_s18, [#allocation15], %s1261_s27, %s1261_s27, %s1262_s28  }
 0x5b8   :  { %1254 = dma.done.wait [#allocation4], 256  }
 0x5b9   :  { %1255 = vsyncadd [#allocation4], 4294967040 }
 0x5ba   :  { %1256 = dma.done.wait [#allocation15], 512  }
 0x5bb   :  { %1257 = vsyncadd [#allocation15], 4294966784 }
 0x5bc   :  { %934 = vsyncpa [#allocation3], 1 }
 0x5bd   :  { %935 = vsyncpa [#allocation6], 1 }
 0x5be   :  { %936 = vsyncpa [#allocation9], 1 }
 0x5bf   :  { %937 = vsyncpa [#allocation12], 1 }
 0x5c0   :  { %938 = vsyncpa [#allocation4], 1 }
 0x5c1   :  { %939 = vsyncpa [#allocation15], 1 }

</bundles_post_ra>
